<compile_context>
chip_gen: v6e
topology: v6e:2x2x1
jax: 0.10.0
libtpu: 0.0.40
codegen_flags: <defaults>
</compile_context>

<pallas_src>
import jax
import jax.numpy as jnp
from jax import lax
from jax.experimental import pallas as pl
from jax.experimental.pallas import tpu as pltpu

EMBED = 3          # embedding_size in the PyTorch module
HIDDEN = 5         # n_hidden
NUM_CLASSES = 2    # num_classes


def make_bilstm_kernel(T, Bp, V):
    """Returns a kernel specialized to static (T, Bp, vocab)."""
    H = HIDDEN
    H2, H4, H6, H8 = 2 * H, 4 * H, 6 * H, 8 * H

    def kernel(tok_ref, epf_ref, epb_ref, b_ref, whh_ref, fcw_ref, fcb_ref, out_ref):
        # tok_ref: (T*Bp, 1) i32   time-major token ids (batch padded)
        # epf_ref/epb_ref: (V, 8H) embedding folded into per-direction input projection
        # b_ref:   (1, 8H)         b_ih + b_hh, packed gate-major [i|f|o|g]x[fwd|bwd]
        # whh_ref: (2H, 8H)        block-diagonal recurrent weights
        # fcw_ref: (2H, C), fcb_ref: (1, C), out_ref: (Bp, C)

        # --- In-kernel embedding gather fused with the hoisted input projection -----
        # One-hot matmul gather (exact, fully vectorized); both slabs stay as SSA
        # values — no VMEM scratch, no per-step vst/vld on the recurrent chain.
        onehot = (tok_ref[...] ==
                  lax.broadcasted_iota(jnp.int32, (T * Bp, V), 1)).astype(jnp.float32)
        xg_f = (jnp.dot(onehot, epf_ref[...], preferred_element_type=jnp.float32)
                + b_ref[...])                                   # (T*Bp, 8H) fwd lanes
        xg_b = jnp.dot(onehot, epb_ref[...],
                       preferred_element_type=jnp.float32)      # (T*Bp, 8H) bwd lanes

        whh = whh_ref[...]                                       # kept in vregs
        h = jnp.zeros((Bp, H2), jnp.float32)                     # [h_fwd | h_bwd]
        c = jnp.zeros((Bp, H2), jnp.float32)

        # --- Fused fwd+bwd recurrence: forward reads time s, backward reads T-1-s ---
        # TODO(synk): for large T replace the static unroll with
        #             lax.fori_loop(..., unroll=2..4) to bound live ranges / code size.
        for s in range(T):
            rf = s * Bp
            rb = (T - 1 - s) * Bp
            g_all = (xg_f[rf:rf + Bp, :] + xg_b[rb:rb + Bp, :]
                     + jnp.dot(h, whh, preferred_element_type=jnp.float32))  # (Bp, 8H)
            sig = jax.nn.sigmoid(g_all[:, :H6])      # one EUP pass: i|f|o (both dirs)
            g_t = jnp.tanh(g_all[:, H6:])            # one EUP pass: g (both dirs)
            c = sig[:, H2:H4] * c + sig[:, :H2] * g_t
            h = sig[:, H4:H6] * jnp.tanh(c)

        # fc(cat([h_n_fwd, h_n_bwd], dim=1)): h already IS the concatenation -> 1 dot.
        out_ref[...] = (jnp.dot(h, fcw_ref[...], preferred_element_type=jnp.float32)
                        + fcb_ref[...])

    return kernel


@jax.jit
def bilstm_forward(tokens, params):
    """tokens: (B, T) int32 token ids -> logits (B, NUM_CLASSES) float32."""
    B, T = tokens.shape
    H, C = HIDDEN, NUM_CLASSES
    Bp = max(8, ((B + 7) // 8) * 8)                 # pad batch to a full sublane group
    V = params["embproj_f"].shape[0]

    # Only int32 index glue remains outside the kernel (fused into the same jit).
    # TODO(synk): could move even this in-kernel via PrefetchScalarGridSpec ids.
    tok_tm = jnp.pad(tokens.T.astype(jnp.int32), ((0, 0), (0, Bp - B)),
                     constant_values=0).reshape(T * Bp, 1)

    vmem = pl.BlockSpec(memory_space=pltpu.MemorySpace.VMEM)
    out = pl.pallas_call(
        make_bilstm_kernel(T, Bp, V),
        out_shape=jax.ShapeDtypeStruct((Bp, C), jnp.float32),
        in_specs=[vmem] * 7,
        out_specs=vmem,
    )(tok_tm, params["embproj_f"], params["embproj_b"], params["bias"],
      params["whh"], params["fcw"], params["fcb"])
    return out[:B]


def init_params(key, vocab_size):
    """Deterministic synthetic parameters; returns (kernel-packed params, raw PyTorch-layout params)."""
    H, E, C = HIDDEN, EMBED, NUM_CLASSES
    ks = jax.random.split(key, 7)
    embedding = jax.random.normal(ks[0], (vocab_size, E), jnp.float32)
    w_ih = 0.2 * jax.random.normal(ks[1], (2, 4 * H, E), jnp.float32)   # per-dir (4H, E)
    w_hh = 0.2 * jax.random.normal(ks[2], (2, 4 * H, H), jnp.float32)   # per-dir (4H, H)
    b_ih = 0.2 * jax.random.normal(ks[3], (2, 4 * H), jnp.float32)
    b_hh = 0.2 * jax.random.normal(ks[4], (2, 4 * H), jnp.float32)
    fc_w = 0.2 * jax.random.normal(ks[5], (C, 2 * H), jnp.float32)
    fc_b = 0.2 * jax.random.normal(ks[6], (C,), jnp.float32)

    raw = dict(embedding=embedding, w_ih=w_ih, w_hh=w_hh, b_ih=b_ih, b_hh=b_hh,
               fc_w=fc_w, fc_b=fc_b)

    # ---- Kernel packing -------------------------------------------------------------
    # 8H lanes, gate-major: [i(2H) | f(2H) | o(2H) | g(2H)], each 2H = [fwd | bwd].
    # PyTorch gate row order is (i, f, g, o) -> perm to (i, f, o, g).
    perm = jnp.array([0, 1, 3, 2])

    def expand_dir(w4, d):
        # w4: (4, H_out, IN) gate-major weights for one direction (already perm'd).
        wt = jnp.transpose(w4, (2, 0, 1))                        # (IN, 4, H_out)
        out = jnp.zeros((wt.shape[0], 4, 2 * H), jnp.float32)
        out = out.at[:, :, d * H:(d + 1) * H].set(wt)            # place in own dir lanes
        return out.reshape(wt.shape[0], 8 * H)                   # (IN, 8H)

    def pack_wih(d):
        return expand_dir(w_ih[d].reshape(4, H, E)[perm], d)     # (E, 8H)

    def pack_whh(d):
        return expand_dir(w_hh[d].reshape(4, H, H)[perm], d)     # (H, 8H)

    def pack_bias(d):
        b4 = (b_ih[d] + b_hh[d]).reshape(4, H)[perm]
        out = jnp.zeros((4, 2 * H), jnp.float32).at[:, d * H:(d + 1) * H].set(b4)
        return out.reshape(8 * H)

    # Embedding folded into the input projection: in-kernel gather+proj = one-hot matmul.
    embproj_f = embedding @ pack_wih(0)                          # (vocab, 8H), fwd lanes
    embproj_b = embedding @ pack_wih(1)                          # (vocab, 8H), bwd lanes
    whh_blk = jnp.concatenate([pack_whh(0), pack_whh(1)], axis=0)  # (2H, 8H) block-diag
    bias8 = (pack_bias(0) + pack_bias(1)).reshape(1, 8 * H)
    fcw = fc_w.T                                                  # (2H, C)
    fcb = fc_b.reshape(1, C)

    packed = dict(embproj_f=embproj_f, embproj_b=embproj_b, whh=whh_blk,
                  bias=bias8, fcw=fcw, fcb=fcb)
    return packed, raw


def reference_forward(tokens, raw):
    """Pure-JAX reference mirroring the PyTorch forward exactly (gate order i,f,g,o)."""
    H = HIDDEN
    x = jnp.transpose(raw["embedding"][tokens], (1, 0, 2))  # (T, B, E)
    B = x.shape[1]

    def run_dir(xs, w_ih, w_hh, b):
        def step(carry, x_t):
            h, c = carry
            gates = x_t @ w_ih.T + h @ w_hh.T + b
            i = jax.nn.sigmoid(gates[:, 0:H])
            f = jax.nn.sigmoid(gates[:, H:2 * H])
            g = jnp.tanh(gates[:, 2 * H:3 * H])
            o = jax.nn.sigmoid(gates[:, 3 * H:4 * H])
            c = f * c + i * g
            h = o * jnp.tanh(c)
            return (h, c), h
        (h, _), _ = lax.scan(step, (jnp.zeros((B, H)), jnp.zeros((B, H))), xs)
        return h

    h_f = run_dir(x, raw["w_ih"][0], raw["w_hh"][0], raw["b_ih"][0] + raw["b_hh"][0])
    h_b = run_dir(x[::-1], raw["w_ih"][1], raw["w_hh"][1], raw["b_ih"][1] + raw["b_hh"][1])
    enc1 = jnp.concatenate([h_f, h_b], axis=1)               # == cat([h_n[0], h_n[1]], dim=1)
    return enc1 @ raw["fc_w"].T + raw["fc_b"]


if __name__ == "__main__":
    key = jax.random.PRNGKey(0)
    k_tok, k_par = jax.random.split(key)

    B, T, VOCAB = 3, 8, 12                                   # batch_size=3 per the module
    tokens = jax.random.randint(k_tok, (B, T), 0, VOCAB, dtype=jnp.int32)
    params, raw = init_params(k_par, VOCAB)

    out = bilstm_forward(tokens, params)
    out = jax.block_until_ready(out)

    ref = reference_forward(tokens, raw)
    assert out.shape == (B, NUM_CLASSES), out.shape
    assert bool(jnp.all(jnp.isfinite(out)))
    assert bool(jnp.allclose(out, ref, atol=1e-4, rtol=1e-4)), (out, ref)
    print("KERNEL_OK")
</pallas_src>

<mosaic_0001>
module attributes {stable_mosaic.version = 11 : i64} {
  func.func @kernel(%arg0: memref<64x1xi32, #tpu.memory_space<vmem>>, %arg1: memref<12x40xf32, #tpu.memory_space<vmem>>, %arg2: memref<12x40xf32, #tpu.memory_space<vmem>>, %arg3: memref<1x40xf32, #tpu.memory_space<vmem>>, %arg4: memref<10x40xf32, #tpu.memory_space<vmem>>, %arg5: memref<10x2xf32, #tpu.memory_space<vmem>>, %arg6: memref<1x2xf32, #tpu.memory_space<vmem>>, %arg7: memref<8x2xf32, #tpu.memory_space<vmem>>) attributes {dimension_semantics = [], scalar_prefetch = 0 : i64, scratch_operands = 0 : i64, tpu.core_type = #tpu.core_type<tc>} {
    %c0 = arith.constant 0 : index
    %c0_0 = arith.constant 0 : index
    %0 = vector.load %arg0[%c0, %c0_0] : memref<64x1xi32, #tpu.memory_space<vmem>>, vector<64x1xi32>
    %1 = tpu.iota {dimensions = array<i32: 1>} : vector<64x12xi32>
    %2 = vector.broadcast %0 : vector<64x1xi32> to vector<64x12xi32>
    %3 = arith.cmpi eq, %2, %1 : vector<64x12xi32>
    %4 = arith.extui %3 : vector<64x12xi1> to vector<64x12xi32>
    %5 = arith.sitofp %4 : vector<64x12xi32> to vector<64x12xf32>
    %c0_1 = arith.constant 0 : index
    %c0_2 = arith.constant 0 : index
    %6 = vector.load %arg1[%c0_1, %c0_2] : memref<12x40xf32, #tpu.memory_space<vmem>>, vector<12x40xf32>
    %cst = arith.constant dense<0.000000e+00> : vector<64x40xf32>
    %7 = tpu.matmul %5, %6, %cst {dimension_numbers = #tpu.dot_dimension_numbers<[1], [0], [0], [1], [0, 0, 1, 1], [], []>} : vector<64x12xf32>, vector<12x40xf32>, vector<64x40xf32> -> vector<64x40xf32>
    %c0_3 = arith.constant 0 : index
    %c0_4 = arith.constant 0 : index
    %8 = vector.load %arg3[%c0_3, %c0_4] : memref<1x40xf32, #tpu.memory_space<vmem>>, vector<1x40xf32>
    %9 = vector.broadcast %8 : vector<1x40xf32> to vector<64x40xf32>
    %10 = arith.addf %7, %9 : vector<64x40xf32>
    %c0_5 = arith.constant 0 : index
    %c0_6 = arith.constant 0 : index
    %11 = vector.load %arg2[%c0_5, %c0_6] : memref<12x40xf32, #tpu.memory_space<vmem>>, vector<12x40xf32>
    %cst_7 = arith.constant dense<0.000000e+00> : vector<64x40xf32>
    %12 = tpu.matmul %5, %11, %cst_7 {dimension_numbers = #tpu.dot_dimension_numbers<[1], [0], [0], [1], [0, 0, 1, 1], [], []>} : vector<64x12xf32>, vector<12x40xf32>, vector<64x40xf32> -> vector<64x40xf32>
    %c0_8 = arith.constant 0 : index
    %c0_9 = arith.constant 0 : index
    %13 = vector.load %arg4[%c0_8, %c0_9] : memref<10x40xf32, #tpu.memory_space<vmem>>, vector<10x40xf32>
    %cst_10 = arith.constant 0.000000e+00 : f32
    %14 = vector.broadcast %cst_10 : f32 to vector<8x10xf32>
    %cst_11 = arith.constant 0.000000e+00 : f32
    %15 = vector.broadcast %cst_11 : f32 to vector<8x10xf32>
    %16 = vector.extract_strided_slice %10 {offsets = [0, 0], sizes = [8, 40], strides = [1, 1]} : vector<64x40xf32> to vector<8x40xf32>
    %17 = vector.extract_strided_slice %12 {offsets = [56, 0], sizes = [8, 40], strides = [1, 1]} : vector<64x40xf32> to vector<8x40xf32>
    %18 = arith.addf %16, %17 : vector<8x40xf32>
    %cst_12 = arith.constant dense<0.000000e+00> : vector<8x40xf32>
    %19 = tpu.matmul %14, %13, %cst_12 {dimension_numbers = #tpu.dot_dimension_numbers<[1], [0], [0], [1], [0, 0, 1, 1], [], []>} : vector<8x10xf32>, vector<10x40xf32>, vector<8x40xf32> -> vector<8x40xf32>
    %20 = arith.addf %18, %19 : vector<8x40xf32>
    %21 = vector.extract_strided_slice %20 {offsets = [0, 0], sizes = [8, 30], strides = [1, 1]} : vector<8x40xf32> to vector<8x30xf32>
    %22 = arith.negf %21 : vector<8x30xf32>
    %23 = math.exp %22 : vector<8x30xf32>
    %cst_13 = arith.constant 1.000000e+00 : f32
    %24 = vector.broadcast %cst_13 : f32 to vector<8x30xf32>
    %25 = arith.addf %24, %23 : vector<8x30xf32>
    %26 = arith.divf %24, %25 : vector<8x30xf32>
    %27 = vector.extract_strided_slice %20 {offsets = [0, 30], sizes = [8, 10], strides = [1, 1]} : vector<8x40xf32> to vector<8x10xf32>
    %28 = math.tanh %27 : vector<8x10xf32>
    %29 = vector.extract_strided_slice %26 {offsets = [0, 10], sizes = [8, 10], strides = [1, 1]} : vector<8x30xf32> to vector<8x10xf32>
    %30 = arith.mulf %29, %15 : vector<8x10xf32>
    %31 = vector.extract_strided_slice %26 {offsets = [0, 0], sizes = [8, 10], strides = [1, 1]} : vector<8x30xf32> to vector<8x10xf32>
    %32 = arith.mulf %31, %28 : vector<8x10xf32>
    %33 = arith.addf %30, %32 : vector<8x10xf32>
    %34 = vector.extract_strided_slice %26 {offsets = [0, 20], sizes = [8, 10], strides = [1, 1]} : vector<8x30xf32> to vector<8x10xf32>
    %35 = math.tanh %33 : vector<8x10xf32>
    %36 = arith.mulf %34, %35 : vector<8x10xf32>
    %37 = vector.extract_strided_slice %10 {offsets = [8, 0], sizes = [8, 40], strides = [1, 1]} : vector<64x40xf32> to vector<8x40xf32>
    %38 = vector.extract_strided_slice %12 {offsets = [48, 0], sizes = [8, 40], strides = [1, 1]} : vector<64x40xf32> to vector<8x40xf32>
    %39 = arith.addf %37, %38 : vector<8x40xf32>
    %cst_14 = arith.constant dense<0.000000e+00> : vector<8x40xf32>
    %40 = tpu.matmul %36, %13, %cst_14 {dimension_numbers = #tpu.dot_dimension_numbers<[1], [0], [0], [1], [0, 0, 1, 1], [], []>} : vector<8x10xf32>, vector<10x40xf32>, vector<8x40xf32> -> vector<8x40xf32>
    %41 = arith.addf %39, %40 : vector<8x40xf32>
    %42 = vector.extract_strided_slice %41 {offsets = [0, 0], sizes = [8, 30], strides = [1, 1]} : vector<8x40xf32> to vector<8x30xf32>
    %43 = arith.negf %42 : vector<8x30xf32>
    %44 = math.exp %43 : vector<8x30xf32>
    %cst_15 = arith.constant 1.000000e+00 : f32
    %45 = vector.broadcast %cst_15 : f32 to vector<8x30xf32>
    %46 = arith.addf %45, %44 : vector<8x30xf32>
    %47 = arith.divf %45, %46 : vector<8x30xf32>
    %48 = vector.extract_strided_slice %41 {offsets = [0, 30], sizes = [8, 10], strides = [1, 1]} : vector<8x40xf32> to vector<8x10xf32>
    %49 = math.tanh %48 : vector<8x10xf32>
    %50 = vector.extract_strided_slice %47 {offsets = [0, 10], sizes = [8, 10], strides = [1, 1]} : vector<8x30xf32> to vector<8x10xf32>
    %51 = arith.mulf %50, %33 : vector<8x10xf32>
    %52 = vector.extract_strided_slice %47 {offsets = [0, 0], sizes = [8, 10], strides = [1, 1]} : vector<8x30xf32> to vector<8x10xf32>
    %53 = arith.mulf %52, %49 : vector<8x10xf32>
    %54 = arith.addf %51, %53 : vector<8x10xf32>
    %55 = vector.extract_strided_slice %47 {offsets = [0, 20], sizes = [8, 10], strides = [1, 1]} : vector<8x30xf32> to vector<8x10xf32>
    %56 = math.tanh %54 : vector<8x10xf32>
    %57 = arith.mulf %55, %56 : vector<8x10xf32>
    %58 = vector.extract_strided_slice %10 {offsets = [16, 0], sizes = [8, 40], strides = [1, 1]} : vector<64x40xf32> to vector<8x40xf32>
    %59 = vector.extract_strided_slice %12 {offsets = [40, 0], sizes = [8, 40], strides = [1, 1]} : vector<64x40xf32> to vector<8x40xf32>
    %60 = arith.addf %58, %59 : vector<8x40xf32>
    %cst_16 = arith.constant dense<0.000000e+00> : vector<8x40xf32>
    %61 = tpu.matmul %57, %13, %cst_16 {dimension_numbers = #tpu.dot_dimension_numbers<[1], [0], [0], [1], [0, 0, 1, 1], [], []>} : vector<8x10xf32>, vector<10x40xf32>, vector<8x40xf32> -> vector<8x40xf32>
    %62 = arith.addf %60, %61 : vector<8x40xf32>
    %63 = vector.extract_strided_slice %62 {offsets = [0, 0], sizes = [8, 30], strides = [1, 1]} : vector<8x40xf32> to vector<8x30xf32>
    %64 = arith.negf %63 : vector<8x30xf32>
    %65 = math.exp %64 : vector<8x30xf32>
    %cst_17 = arith.constant 1.000000e+00 : f32
    %66 = vector.broadcast %cst_17 : f32 to vector<8x30xf32>
    %67 = arith.addf %66, %65 : vector<8x30xf32>
    %68 = arith.divf %66, %67 : vector<8x30xf32>
    %69 = vector.extract_strided_slice %62 {offsets = [0, 30], sizes = [8, 10], strides = [1, 1]} : vector<8x40xf32> to vector<8x10xf32>
    %70 = math.tanh %69 : vector<8x10xf32>
    %71 = vector.extract_strided_slice %68 {offsets = [0, 10], sizes = [8, 10], strides = [1, 1]} : vector<8x30xf32> to vector<8x10xf32>
    %72 = arith.mulf %71, %54 : vector<8x10xf32>
    %73 = vector.extract_strided_slice %68 {offsets = [0, 0], sizes = [8, 10], strides = [1, 1]} : vector<8x30xf32> to vector<8x10xf32>
    %74 = arith.mulf %73, %70 : vector<8x10xf32>
    %75 = arith.addf %72, %74 : vector<8x10xf32>
    %76 = vector.extract_strided_slice %68 {offsets = [0, 20], sizes = [8, 10], strides = [1, 1]} : vector<8x30xf32> to vector<8x10xf32>
    %77 = math.tanh %75 : vector<8x10xf32>
    %78 = arith.mulf %76, %77 : vector<8x10xf32>
    %79 = vector.extract_strided_slice %10 {offsets = [24, 0], sizes = [8, 40], strides = [1, 1]} : vector<64x40xf32> to vector<8x40xf32>
    %80 = vector.extract_strided_slice %12 {offsets = [32, 0], sizes = [8, 40], strides = [1, 1]} : vector<64x40xf32> to vector<8x40xf32>
    %81 = arith.addf %79, %80 : vector<8x40xf32>
    %cst_18 = arith.constant dense<0.000000e+00> : vector<8x40xf32>
    %82 = tpu.matmul %78, %13, %cst_18 {dimension_numbers = #tpu.dot_dimension_numbers<[1], [0], [0], [1], [0, 0, 1, 1], [], []>} : vector<8x10xf32>, vector<10x40xf32>, vector<8x40xf32> -> vector<8x40xf32>
    %83 = arith.addf %81, %82 : vector<8x40xf32>
    %84 = vector.extract_strided_slice %83 {offsets = [0, 0], sizes = [8, 30], strides = [1, 1]} : vector<8x40xf32> to vector<8x30xf32>
    %85 = arith.negf %84 : vector<8x30xf32>
    %86 = math.exp %85 : vector<8x30xf32>
    %cst_19 = arith.constant 1.000000e+00 : f32
    %87 = vector.broadcast %cst_19 : f32 to vector<8x30xf32>
    %88 = arith.addf %87, %86 : vector<8x30xf32>
    %89 = arith.divf %87, %88 : vector<8x30xf32>
    %90 = vector.extract_strided_slice %83 {offsets = [0, 30], sizes = [8, 10], strides = [1, 1]} : vector<8x40xf32> to vector<8x10xf32>
    %91 = math.tanh %90 : vector<8x10xf32>
    %92 = vector.extract_strided_slice %89 {offsets = [0, 10], sizes = [8, 10], strides = [1, 1]} : vector<8x30xf32> to vector<8x10xf32>
    %93 = arith.mulf %92, %75 : vector<8x10xf32>
    %94 = vector.extract_strided_slice %89 {offsets = [0, 0], sizes = [8, 10], strides = [1, 1]} : vector<8x30xf32> to vector<8x10xf32>
    %95 = arith.mulf %94, %91 : vector<8x10xf32>
    %96 = arith.addf %93, %95 : vector<8x10xf32>
    %97 = vector.extract_strided_slice %89 {offsets = [0, 20], sizes = [8, 10], strides = [1, 1]} : vector<8x30xf32> to vector<8x10xf32>
    %98 = math.tanh %96 : vector<8x10xf32>
    %99 = arith.mulf %97, %98 : vector<8x10xf32>
    %100 = vector.extract_strided_slice %10 {offsets = [32, 0], sizes = [8, 40], strides = [1, 1]} : vector<64x40xf32> to vector<8x40xf32>
    %101 = vector.extract_strided_slice %12 {offsets = [24, 0], sizes = [8, 40], strides = [1, 1]} : vector<64x40xf32> to vector<8x40xf32>
    %102 = arith.addf %100, %101 : vector<8x40xf32>
    %cst_20 = arith.constant dense<0.000000e+00> : vector<8x40xf32>
    %103 = tpu.matmul %99, %13, %cst_20 {dimension_numbers = #tpu.dot_dimension_numbers<[1], [0], [0], [1], [0, 0, 1, 1], [], []>} : vector<8x10xf32>, vector<10x40xf32>, vector<8x40xf32> -> vector<8x40xf32>
    %104 = arith.addf %102, %103 : vector<8x40xf32>
    %105 = vector.extract_strided_slice %104 {offsets = [0, 0], sizes = [8, 30], strides = [1, 1]} : vector<8x40xf32> to vector<8x30xf32>
    %106 = arith.negf %105 : vector<8x30xf32>
    %107 = math.exp %106 : vector<8x30xf32>
    %cst_21 = arith.constant 1.000000e+00 : f32
    %108 = vector.broadcast %cst_21 : f32 to vector<8x30xf32>
    %109 = arith.addf %108, %107 : vector<8x30xf32>
    %110 = arith.divf %108, %109 : vector<8x30xf32>
    %111 = vector.extract_strided_slice %104 {offsets = [0, 30], sizes = [8, 10], strides = [1, 1]} : vector<8x40xf32> to vector<8x10xf32>
    %112 = math.tanh %111 : vector<8x10xf32>
    %113 = vector.extract_strided_slice %110 {offsets = [0, 10], sizes = [8, 10], strides = [1, 1]} : vector<8x30xf32> to vector<8x10xf32>
    %114 = arith.mulf %113, %96 : vector<8x10xf32>
    %115 = vector.extract_strided_slice %110 {offsets = [0, 0], sizes = [8, 10], strides = [1, 1]} : vector<8x30xf32> to vector<8x10xf32>
    %116 = arith.mulf %115, %112 : vector<8x10xf32>
    %117 = arith.addf %114, %116 : vector<8x10xf32>
    %118 = vector.extract_strided_slice %110 {offsets = [0, 20], sizes = [8, 10], strides = [1, 1]} : vector<8x30xf32> to vector<8x10xf32>
    %119 = math.tanh %117 : vector<8x10xf32>
    %120 = arith.mulf %118, %119 : vector<8x10xf32>
    %121 = vector.extract_strided_slice %10 {offsets = [40, 0], sizes = [8, 40], strides = [1, 1]} : vector<64x40xf32> to vector<8x40xf32>
    %122 = vector.extract_strided_slice %12 {offsets = [16, 0], sizes = [8, 40], strides = [1, 1]} : vector<64x40xf32> to vector<8x40xf32>
    %123 = arith.addf %121, %122 : vector<8x40xf32>
    %cst_22 = arith.constant dense<0.000000e+00> : vector<8x40xf32>
    %124 = tpu.matmul %120, %13, %cst_22 {dimension_numbers = #tpu.dot_dimension_numbers<[1], [0], [0], [1], [0, 0, 1, 1], [], []>} : vector<8x10xf32>, vector<10x40xf32>, vector<8x40xf32> -> vector<8x40xf32>
    %125 = arith.addf %123, %124 : vector<8x40xf32>
    %126 = vector.extract_strided_slice %125 {offsets = [0, 0], sizes = [8, 30], strides = [1, 1]} : vector<8x40xf32> to vector<8x30xf32>
    %127 = arith.negf %126 : vector<8x30xf32>
    %128 = math.exp %127 : vector<8x30xf32>
    %cst_23 = arith.constant 1.000000e+00 : f32
    %129 = vector.broadcast %cst_23 : f32 to vector<8x30xf32>
    %130 = arith.addf %129, %128 : vector<8x30xf32>
    %131 = arith.divf %129, %130 : vector<8x30xf32>
    %132 = vector.extract_strided_slice %125 {offsets = [0, 30], sizes = [8, 10], strides = [1, 1]} : vector<8x40xf32> to vector<8x10xf32>
    %133 = math.tanh %132 : vector<8x10xf32>
    %134 = vector.extract_strided_slice %131 {offsets = [0, 10], sizes = [8, 10], strides = [1, 1]} : vector<8x30xf32> to vector<8x10xf32>
    %135 = arith.mulf %134, %117 : vector<8x10xf32>
    %136 = vector.extract_strided_slice %131 {offsets = [0, 0], sizes = [8, 10], strides = [1, 1]} : vector<8x30xf32> to vector<8x10xf32>
    %137 = arith.mulf %136, %133 : vector<8x10xf32>
    %138 = arith.addf %135, %137 : vector<8x10xf32>
    %139 = vector.extract_strided_slice %131 {offsets = [0, 20], sizes = [8, 10], strides = [1, 1]} : vector<8x30xf32> to vector<8x10xf32>
    %140 = math.tanh %138 : vector<8x10xf32>
    %141 = arith.mulf %139, %140 : vector<8x10xf32>
    %142 = vector.extract_strided_slice %10 {offsets = [48, 0], sizes = [8, 40], strides = [1, 1]} : vector<64x40xf32> to vector<8x40xf32>
    %143 = vector.extract_strided_slice %12 {offsets = [8, 0], sizes = [8, 40], strides = [1, 1]} : vector<64x40xf32> to vector<8x40xf32>
    %144 = arith.addf %142, %143 : vector<8x40xf32>
    %cst_24 = arith.constant dense<0.000000e+00> : vector<8x40xf32>
    %145 = tpu.matmul %141, %13, %cst_24 {dimension_numbers = #tpu.dot_dimension_numbers<[1], [0], [0], [1], [0, 0, 1, 1], [], []>} : vector<8x10xf32>, vector<10x40xf32>, vector<8x40xf32> -> vector<8x40xf32>
    %146 = arith.addf %144, %145 : vector<8x40xf32>
    %147 = vector.extract_strided_slice %146 {offsets = [0, 0], sizes = [8, 30], strides = [1, 1]} : vector<8x40xf32> to vector<8x30xf32>
    %148 = arith.negf %147 : vector<8x30xf32>
    %149 = math.exp %148 : vector<8x30xf32>
    %cst_25 = arith.constant 1.000000e+00 : f32
    %150 = vector.broadcast %cst_25 : f32 to vector<8x30xf32>
    %151 = arith.addf %150, %149 : vector<8x30xf32>
    %152 = arith.divf %150, %151 : vector<8x30xf32>
    %153 = vector.extract_strided_slice %146 {offsets = [0, 30], sizes = [8, 10], strides = [1, 1]} : vector<8x40xf32> to vector<8x10xf32>
    %154 = math.tanh %153 : vector<8x10xf32>
    %155 = vector.extract_strided_slice %152 {offsets = [0, 10], sizes = [8, 10], strides = [1, 1]} : vector<8x30xf32> to vector<8x10xf32>
    %156 = arith.mulf %155, %138 : vector<8x10xf32>
    %157 = vector.extract_strided_slice %152 {offsets = [0, 0], sizes = [8, 10], strides = [1, 1]} : vector<8x30xf32> to vector<8x10xf32>
    %158 = arith.mulf %157, %154 : vector<8x10xf32>
    %159 = arith.addf %156, %158 : vector<8x10xf32>
    %160 = vector.extract_strided_slice %152 {offsets = [0, 20], sizes = [8, 10], strides = [1, 1]} : vector<8x30xf32> to vector<8x10xf32>
    %161 = math.tanh %159 : vector<8x10xf32>
    %162 = arith.mulf %160, %161 : vector<8x10xf32>
    %163 = vector.extract_strided_slice %10 {offsets = [56, 0], sizes = [8, 40], strides = [1, 1]} : vector<64x40xf32> to vector<8x40xf32>
    %164 = vector.extract_strided_slice %12 {offsets = [0, 0], sizes = [8, 40], strides = [1, 1]} : vector<64x40xf32> to vector<8x40xf32>
    %165 = arith.addf %163, %164 : vector<8x40xf32>
    %cst_26 = arith.constant dense<0.000000e+00> : vector<8x40xf32>
    %166 = tpu.matmul %162, %13, %cst_26 {dimension_numbers = #tpu.dot_dimension_numbers<[1], [0], [0], [1], [0, 0, 1, 1], [], []>} : vector<8x10xf32>, vector<10x40xf32>, vector<8x40xf32> -> vector<8x40xf32>
    %167 = arith.addf %165, %166 : vector<8x40xf32>
    %168 = vector.extract_strided_slice %167 {offsets = [0, 0], sizes = [8, 30], strides = [1, 1]} : vector<8x40xf32> to vector<8x30xf32>
    %169 = arith.negf %168 : vector<8x30xf32>
    %170 = math.exp %169 : vector<8x30xf32>
    %cst_27 = arith.constant 1.000000e+00 : f32
    %171 = vector.broadcast %cst_27 : f32 to vector<8x30xf32>
    %172 = arith.addf %171, %170 : vector<8x30xf32>
    %173 = arith.divf %171, %172 : vector<8x30xf32>
    %174 = vector.extract_strided_slice %167 {offsets = [0, 30], sizes = [8, 10], strides = [1, 1]} : vector<8x40xf32> to vector<8x10xf32>
    %175 = math.tanh %174 : vector<8x10xf32>
    %176 = vector.extract_strided_slice %173 {offsets = [0, 10], sizes = [8, 10], strides = [1, 1]} : vector<8x30xf32> to vector<8x10xf32>
    %177 = arith.mulf %176, %159 : vector<8x10xf32>
    %178 = vector.extract_strided_slice %173 {offsets = [0, 0], sizes = [8, 10], strides = [1, 1]} : vector<8x30xf32> to vector<8x10xf32>
    %179 = arith.mulf %178, %175 : vector<8x10xf32>
    %180 = arith.addf %177, %179 : vector<8x10xf32>
    %181 = vector.extract_strided_slice %173 {offsets = [0, 20], sizes = [8, 10], strides = [1, 1]} : vector<8x30xf32> to vector<8x10xf32>
    %182 = math.tanh %180 : vector<8x10xf32>
    %183 = arith.mulf %181, %182 : vector<8x10xf32>
    %c0_28 = arith.constant 0 : index
    %c0_29 = arith.constant 0 : index
    %184 = vector.load %arg5[%c0_28, %c0_29] : memref<10x2xf32, #tpu.memory_space<vmem>>, vector<10x2xf32>
    %cst_30 = arith.constant dense<0.000000e+00> : vector<8x2xf32>
    %185 = tpu.matmul %183, %184, %cst_30 {dimension_numbers = #tpu.dot_dimension_numbers<[1], [0], [0], [1], [0, 0, 1, 1], [], []>} : vector<8x10xf32>, vector<10x2xf32>, vector<8x2xf32> -> vector<8x2xf32>
    %c0_31 = arith.constant 0 : index
    %c0_32 = arith.constant 0 : index
    %186 = vector.load %arg6[%c0_31, %c0_32] : memref<1x2xf32, #tpu.memory_space<vmem>>, vector<1x2xf32>
    %187 = vector.broadcast %186 : vector<1x2xf32> to vector<8x2xf32>
    %188 = arith.addf %185, %187 : vector<8x2xf32>
    %c0_33 = arith.constant 0 : index
    %c0_34 = arith.constant 0 : index
    %189 = vector.load %arg7[%c0_33, %c0_34] : memref<8x2xf32, #tpu.memory_space<vmem>>, vector<8x2xf32>
    tpu.vector_store %arg7[%c0_33, %c0_34], %188 {strides = array<i32>} : memref<8x2xf32, #tpu.memory_space<vmem>>, vector<8x2xf32>,
    return
  }
}

</mosaic_0001>

<bundles_post_ra>
// kernel: bilstm_forward.1
= control target key start
LH: loop header
LB: loop body
LE: loop exit
PB: predicated region body
PF: predicated region fallthrough
CT: control target
= control target key end

     0   :  { %v1510_v0 = vmov 0   ;;  %vm118_vm0 = vcmask 1043456   ;;  %v1511_v11 = vmov 0.0   ;;  %v34_v14 = vlaneseq  ;;  %s1514_s27 = smov 10   ;;  %s1515_s28 = smov 108   ;;  %s1768_s0 = inlined_call_operand.vmem [shape: s32[64,1], index: 0, kind: input, shape index: {}]   ;;  %s1769_s1 = inlined_call_operand.vmem [shape: f32[12,40], index: 1, kind: input, shape index: {}]   ;;  %s1770_s2 = inlined_call_operand.vmem [shape: f32[12,40], index: 2, kind: input, shape index: {}]   ;;  %s1771_s4 = inlined_call_operand.vmem [shape: f32[10,40], index: 4, kind: input, shape index: {}]   ;;  %s1772_s3 = inlined_call_operand.vmem [shape: f32[1,40], index: 3, kind: input, shape index: {}]   ;;  %s1773_s5 = inlined_call_operand.vmem [shape: f32[10,2], index: 5, kind: input, shape index: {}]   ;;  %s1774_s6 = inlined_call_operand.vmem [shape: f32[1,2], index: 6, kind: input, shape index: {}]   ;;  %s1775_s7 = inlined_call_operand.vmem [shape: f32[8,2], index: 7, kind: output, shape index: {}]  }
   0x1   :  { %1445 = vset.pattern.permute.xlu1 %v1510_v0  ;;  %1444 = vset.pattern.permute.xlu0 %v1510_v0  ;;  %v28_v1 = vld [vmem:[%s1768_s0 + $0x10] sm:$0xff]  ;;  %v26_v2 = vld [vmem:[%s1768_s0] sm:$0xff]  ;;  %v29_v3 = vld [vmem:[%s1768_s0 + $0x18] sm:$0xff]  ;;  %vm93_vm1 = vcmask 97280   ;;  %vm344_vm5 = vcmask 1041408   ;;  %vm1512_vm11 = vmmov 0  }
   0x2   :  { %43 = vperm.xlu1 %1445, %v28_v1   ;;  %37 = vperm.xlu0 %1444, %v26_v2   ;;  %v27_v4 = vld [vmem:[%s1768_s0 + $0x8] sm:$0xff]  ;;  %v84_v7 = vld [vmem:[%s1769_s1] sm:$0xff]  ;;  %v33_v12 = vld [vmem:[%s1768_s0 + $0x38] sm:$0xff]  ;;  %v35_v15 = vand.u32 127, %v34_v14  ;;  %vm340_vm12 = vcmask 80896   ;;  %vm1237_vm13 = vcmask 15360  }
   0x3   :  { %v85_v5 = vld [vmem:[%s1769_s1 + $0x8] sm:$0xf]  ;;  %v227_v8 = vld [vmem:[%s1770_s2] sm:$0xff]  ;;  %v32_v13 = vld [vmem:[%s1768_s0 + $0x30] sm:$0xff] }
   0x4   :  { %1343 = vmatprep.subr.msk.mxu0 %vm118_vm0, %v85_v5  ;;  %v228_v6 = vld [vmem:[%s1770_s2 + $0x8] sm:$0xf]  ;;  %v30_v10 = vld [vmem:[%s1768_s0 + $0x20] sm:$0xff] }
   0x5   :  { %1344 = vmatpush3.msk.msra.mxu0 %vm118_vm0, %v85_v5  ;;  %1359 = vmatprep.subr.msk.mxu1 %vm118_vm0, %v228_v6  ;;  %v31_v9 = vld [vmem:[%s1768_s0 + $0x28] sm:$0xff]  ;;  %v1613_v24 = vld [vmem:[%s1771_s4] sm:$0xff] }
   0x6   :  { %46 = vperm.xlu1 %1445, %v29_v3   ;;  %40 = vperm.xlu0 %1444, %v27_v4   ;;  %v1605_v22 = vld [vmem:[%s1771_s4 + $0x8] sm:$0x3]  ;;  %v1251_v34 = vld [vmem:[%s1772_s3] ss:$0 sm:$0xff]  ;;  %s1513_s3 = smov 98  }
   0x7   :  { %1345 = vmatprep.subr.mxu0 %v84_v7  ;;  %1360 = vmatpush3.msk.msra.mxu1 %vm118_vm0, %v228_v6 }
   0x8   :  { %1346 = vmatpush3.msra.mxu0 %v84_v7  ;;  %1361 = vmatprep.subr.mxu1 %v227_v8 }
   0x9   :  { %1362 = vmatpush3.msra.mxu1 %v227_v8  ;;  %1375 = vmatprep.subr.mxu0 %v1511_v11 }
   0xa   :  { %52 = vperm.xlu1 %1445, %v31_v9   ;;  %49 = vperm.xlu0 %1444, %v30_v10  }
   0xb   :  { %1382 = vmatprep.subr.mxu1 %v1511_v11 }
   0xe   :  { %58 = vperm.xlu1 %1445, %v33_v12   ;;  %55 = vperm.xlu0 %1444, %v32_v13  }
  0x7d   :  { %v44_v16 = vpop.permute.xlu1 %43  ;;  %v38_v17 = vpop.permute.xlu0 %37 }
  0x7e   :  { %vm60_vm2 = vcmp.eq.s32.totalorder %v38_v17, %v35_v15  ;;  %vm62_vm3 = vcmp.eq.s32.totalorder %v44_v16, %v35_v15 }
  0x7f   :  { %v1243_v18 = vsel %vm60_vm2, 1.0, %v1511_v11  ;;  %v1245_v21 = vsel %vm62_vm3, 1.0, %v1511_v11 }
  0x80   :  { %1347 = vmatprep.mubr.msk.f32.mxu0 %vm93_vm1, %v1243_v18  ;;  %1363 = vmatprep.mubr.msk.f32.mxu1 %vm93_vm1, %v1243_v18 }
  0x81   :  { %v47_v19 = vpop.permute.xlu1 %46  ;;  %v41_v20 = vpop.permute.xlu0 %40 }
  0x82   :  { %vm61_vm4 = vcmp.eq.s32.totalorder %v41_v20, %v35_v15  ;;  %vm63_vm6 = vcmp.eq.s32.totalorder %v47_v19, %v35_v15 }
  0x83   :  { %v1244_v23 = vsel %vm61_vm4, 1.0, %v1511_v11  ;;  %v1246_v27 = vsel %vm63_vm6, 1.0, %v1511_v11 }
  0x84   :  { %1348 = vmatmul.mubr.msk.f32.vlgmr.msra.gmra.mxu0 %vm93_vm1, %v1244_v23  ;;  %1364 = vmatmul.mubr.msk.f32.vlgmr.msra.gmra.mxu1 %vm93_vm1, %v1244_v23 }
  0x85   :  { %1376 = vmatpush3.msk.msra.mxu0 %vm344_vm5, %v1605_v22  ;;  %v53_v25 = vpop.permute.xlu1 %52  ;;  %1350 = vmatprep.mubr.msk.f32.mxu0 %vm93_vm1, %v1245_v21  ;;  %v50_v26 = vpop.permute.xlu0 %49 }
  0x86   :  { %1366 = vmatprep.mubr.msk.f32.mxu1 %vm93_vm1, %v1245_v21  ;;  %vm64_vm7 = vcmp.eq.s32.totalorder %v50_v26, %v35_v15  ;;  %1377 = vmatprep.subr.mxu0 %v1511_v11  ;;  %vm65_vm8 = vcmp.eq.s32.totalorder %v53_v25, %v35_v15 }
  0x87   :  { %v1247_v28 = vsel %vm64_vm7, 1.0, %v1511_v11  ;;  %1378 = vmatpush3.msra.mxu0 %v1613_v24  ;;  %1383 = vmatpush3.msk.msra.mxu1 %vm344_vm5, %v1605_v22  ;;  %v1248_v31 = vsel %vm65_vm8, 1.0, %v1511_v11 }
  0x88   :  { %1351 = vmatmul.mubr.msk.f32.gmra.mxu0 %vm93_vm1, %v1246_v27  ;;  %1367 = vmatmul.mubr.msk.f32.gmra.mxu1 %vm93_vm1, %v1246_v27 }
  0x89   :  { %v59_v29 = vpop.permute.xlu1 %58  ;;  %1353 = vmatprep.mubr.msk.f32.mxu0 %vm93_vm1, %v1247_v28  ;;  %1369 = vmatprep.mubr.msk.f32.mxu1 %vm93_vm1, %v1247_v28  ;;  %v56_v30 = vpop.permute.xlu0 %55 }
  0x8a   :  { %vm66_vm9 = vcmp.eq.s32.totalorder %v56_v30, %v35_v15  ;;  %1384 = vmatprep.subr.mxu1 %v1511_v11  ;;  %1389 = vmatprep.subr.mxu0 %v1511_v11  ;;  %vm67_vm10 = vcmp.eq.s32.totalorder %v59_v29, %v35_v15 }
  0x8b   :  { %v1249_v32 = vsel %vm66_vm9, 1.0, %v1511_v11  ;;  %1385 = vmatpush3.msra.mxu1 %v1613_v24  ;;  %v1250_v33 = vsel %vm67_vm10, 1.0, %v1511_v11 }
  0x8c   :  { %1354 = vmatmul.mubr.msk.f32.gmra.mxu0 %vm93_vm1, %v1248_v31  ;;  %1370 = vmatmul.mubr.msk.f32.gmra.mxu1 %vm93_vm1, %v1248_v31 }
  0x8d   :  { %1356 = vmatprep.mubr.msk.f32.mxu0 %vm93_vm1, %v1249_v32  ;;  %1372 = vmatprep.mubr.msk.f32.mxu1 %vm93_vm1, %v1249_v32 }
  0x8e   :  { %1396 = vmatprep.subr.mxu1 %v1511_v11 }
  0x90   :  { %1357 = vmatmul.mubr.msk.f32.gmra.mxu0 %vm93_vm1, %v1250_v33  ;;  %1373 = vmatmul.mubr.msk.f32.gmra.mxu1 %vm93_vm1, %v1250_v33 }
  0x91   :  { %1379 = vmatprep.mubr.msk.f32.mxu0 %vm1512_vm11, %v1511_v11  ;;  %1386 = vmatprep.mubr.msk.f32.mxu1 %vm1512_vm11, %v1511_v11 }
  0x94   :  { %1380 = vmatmul.mubr.f32.vlgmr.msra.gmra.mxu0 %v1511_v11 }
  0x95   :  { %1390 = vmatpush3.msk.msra.mxu0 %vm344_vm5, %v1605_v22  ;;  %1393 = vmatprep.mubr.msk.f32.mxu0 %vm1512_vm11, %v1511_v11 }
  0x96   :  { %1391 = vmatprep.subr.mxu0 %v1511_v11 }
  0x97   :  { %1392 = vmatpush3.msra.mxu0 %v1613_v24 }
  0x98   :  { %1403 = vmatprep.subr.mxu0 %v1511_v11 }
 0x144   :  { %v1349_v35 = vpop.f32.mrf.mxu0  ;;  %v1365_v36 = vpop.f32.mrf.mxu1 }
 0x145   :  { %v1657_v37 = vadd.f32 %v1349_v35, %v1251_v34 }
 0x146   :  { %v188_v38 = vpop.f32.mrf.mxu0  ;;  %v298_v39 = vpop.f32.mrf.mxu1 }
 0x147   :  { %v189_v57 = vadd.f32 %v1251_v34, %v188_v38 }
 0x148   :  { %v1352_v40 = vpop.f32.mrf.mxu0  ;;  %v1368_v41 = vpop.f32.mrf.mxu1 }
 0x149   :  { %v204_v42 = vadd.f32 %v1352_v40, %v1251_v34 }
 0x14a   :  { %v198_v43 = vpop.f32.mrf.mxu0  ;;  %v308_v44 = vpop.f32.mrf.mxu1 }
 0x14b   :  { %v199_v45 = vadd.f32 %v1251_v34, %v198_v43 }
 0x14c   :  { %v1355_v46 = vpop.f32.mrf.mxu0  ;;  %v1371_v47 = vpop.f32.mrf.mxu1 }
 0x14d   :  { %v214_v48 = vadd.f32 %v1355_v46, %v1251_v34  ;;  %v1659_v49 = vadd.f32 %v1371_v47, %v199_v45 }
 0x14e   :  { %v208_v50 = vpop.f32.mrf.mxu0  ;;  %v318_v51 = vpop.f32.mrf.mxu1 }
 0x14f   :  { %v209_v52 = vadd.f32 %v1251_v34, %v208_v50  ;;  %v1661_v53 = vadd.f32 %v318_v51, %v204_v42  ;;  %v1663_v54 = vadd.f32 %v308_v44, %v214_v48 }
 0x150   :  { %v1358_v55 = vpop.f32.mrf.mxu0  ;;  %v1374_v56 = vpop.f32.mrf.mxu1 }
 0x151   :  { %v224_v58 = vadd.f32 %v1358_v55, %v1251_v34  ;;  %v1665_v59 = vadd.f32 %v1368_v41, %v209_v52  ;;  %v339_v61 = vadd.f32 %v1374_v56, %v189_v57 }
 0x152   :  { %v218_v60 = vpop.f32.mrf.mxu0  ;;  %v328_v19 = vpop.f32.mrf.mxu1 }
 0x153   :  { %v219_v62 = vadd.f32 %v1251_v34, %v218_v60  ;;  %v1667_v63 = vadd.f32 %v298_v39, %v224_v58  ;;  %v443_v20 = vadd.f32 %v328_v19, %v1657_v37 }
 0x154   :  { %v414_v0 = vpop.f32.mrf.mxu0 }
 0x155   :  { %v418_v1 = vadd.f32 %v414_v0, %v339_v61  ;;  %v1669_v2 = vadd.f32 %v1365_v36, %v219_v62 }
 0x156   :  { %v1381_v3 = vpop.f32.mrf.mxu0 }
 0x157   :  { %1446 = vtanh.f32 %v418_v1  ;;  %v1271_v5 = vmul.f32 -1.442695, %v418_v1 }
 0x159   :  { %1448 = vpow2.f32 %v1271_v5 }
 0x164   :  { %v1447_v4 = vpop.eup %1446 }
 0x165   :  { %428 = vrot.lane.b32.xlu0 %v1447_v4, %s1513_s3 }
 0x166   :  { %v1449_v6 = vpop.eup %1448 }
 0x167   :  { %v422_v7 = vadd.f32 1.0, %v1449_v6 }
 0x169   :  { %1450 = vrcp.f32 %v422_v7 }
 0x176   :  { %v1451_v8 = vpop.eup %1450 }
 0x177   :  { %v426_v12 = vmul.f32 0.0, %v1451_v8 }
 0x1d7   :  { %v429_v9 = vpop.permute.xlu0 %428 }
 0x1d8   :  { %v431_v10 = vmul.f32 %v1451_v8, %v429_v9 }
 0x1da   :  { %433 = vrot.lane.b32.xlu1 %v431_v10, %s1514_s27 }
 0x24c   :  { %v434_v13 = vpop.permute.xlu1 %433 }
 0x24d   :  { %v436_v14 = vadd.f32 %v434_v13, %v426_v12 }
 0x24f   :  { %1452 = vtanh.f32 %v436_v14 }
 0x25c   :  { %v1453_v15 = vpop.eup %1452 }
 0x25d   :  { %439 = vrot.lane.b32.xlu0 %v1453_v15, %s1514_s27 }
 0x2cf   :  { %v440_v16 = vpop.permute.xlu0 %439 }
 0x2d0   :  { %v442_v17 = vmul.f32 %v1451_v8, %v440_v16 }
 0x2d2   :  { %445 = vrot.lane.b32.xlu1 %v442_v17, %s1515_s28 }
 0x344   :  { %v446_v18 = vpop.permute.xlu1 %445 }
 0x345   :  { %1387 = vmatmul.mubr.msk.f32.vlgmr.msra.gmra.mxu1 %vm340_vm12, %v446_v18 }
 0x346   :  { %1397 = vmatpush3.msk.msra.mxu1 %vm344_vm5, %v1605_v22  ;;  %1400 = vmatprep.mubr.msk.f32.mxu1 %vm1512_vm11, %v1511_v11 }
 0x347   :  { %1398 = vmatprep.subr.mxu1 %v1511_v11 }
 0x348   :  { %1399 = vmatpush3.msra.mxu1 %v1613_v24 }
 0x349   :  { %1410 = vmatprep.subr.mxu1 %v1511_v11 }
 0x405   :  { %v515_v21 = vpop.f32.mrf.mxu1 }
 0x406   :  { %v519_v23 = vadd.f32 %v515_v21, %v443_v20 }
 0x407   :  { %v1388_v25 = vpop.f32.mrf.mxu1 }
 0x408   :  { %1454 = vtanh.f32 %v519_v23  ;;  %v1274_v27 = vmul.f32 -1.442695, %v519_v23 }
 0x40a   :  { %1456 = vpow2.f32 %v1274_v27 }
 0x415   :  { %v1455_v26 = vpop.eup %1454 }
 0x416   :  { %529 = vrot.lane.b32.xlu0 %v1455_v26, %s1513_s3 }
 0x417   :  { %v1457_v28 = vpop.eup %1456 }
 0x418   :  { %v523_v29 = vadd.f32 1.0, %v1457_v28 }
 0x41a   :  { %1458 = vrcp.f32 %v523_v29 }
 0x427   :  { %v1459_v30 = vpop.eup %1458 }
 0x428   :  { %v527_v33 = vmul.f32 %v1459_v30, %v436_v14 }
 0x488   :  { %v530_v31 = vpop.permute.xlu0 %529 }
 0x489   :  { %v532_v32 = vmul.f32 %v1459_v30, %v530_v31 }
 0x48b   :  { %534 = vrot.lane.b32.xlu1 %v532_v32, %s1514_s27 }
 0x4fd   :  { %v535_v34 = vpop.permute.xlu1 %534 }
 0x4fe   :  { %v537_v35 = vadd.f32 %v535_v34, %v527_v33 }
 0x500   :  { %1460 = vtanh.f32 %v537_v35 }
 0x50d   :  { %v1461_v36 = vpop.eup %1460 }
 0x50e   :  { %540 = vrot.lane.b32.xlu0 %v1461_v36, %s1514_s27 }
 0x580   :  { %v541_v37 = vpop.permute.xlu0 %540 }
 0x581   :  { %v543_v38 = vmul.f32 %v1459_v30, %v541_v37 }
 0x583   :  { %546 = vrot.lane.b32.xlu1 %v543_v38, %s1515_s28 }
 0x5f5   :  { %v547_v39 = vpop.permute.xlu1 %546 }
 0x5f6   :  { %1394 = vmatmul.mubr.msk.f32.vlgmr.msra.gmra.mxu0 %vm340_vm12, %v547_v39 }
 0x5f7   :  { %1404 = vmatpush3.msk.msra.mxu0 %vm344_vm5, %v1605_v22  ;;  %1407 = vmatprep.mubr.msk.f32.mxu0 %vm1512_vm11, %v1511_v11 }
 0x5f8   :  { %1405 = vmatprep.subr.mxu0 %v1511_v11 }
 0x5f9   :  { %1406 = vmatpush3.msra.mxu0 %v1613_v24 }
 0x5fa   :  { %1417 = vmatprep.subr.mxu0 %v1511_v11 }
 0x6b6   :  { %v616_v40 = vpop.f32.mrf.mxu0 }
 0x6b7   :  { %v620_v41 = vadd.f32 %v616_v40, %v1659_v49 }
 0x6b8   :  { %v1395_v42 = vpop.f32.mrf.mxu0 }
 0x6b9   :  { %1462 = vtanh.f32 %v620_v41  ;;  %v1277_v44 = vmul.f32 -1.442695, %v620_v41 }
 0x6bb   :  { %1464 = vpow2.f32 %v1277_v44 }
 0x6c6   :  { %v1463_v43 = vpop.eup %1462 }
 0x6c7   :  { %630 = vrot.lane.b32.xlu0 %v1463_v43, %s1513_s3 }
 0x6c8   :  { %v1465_v45 = vpop.eup %1464 }
 0x6c9   :  { %v624_v46 = vadd.f32 1.0, %v1465_v45 }
 0x6cb   :  { %1466 = vrcp.f32 %v624_v46 }
 0x6d8   :  { %v1467_v47 = vpop.eup %1466 }
 0x6d9   :  { %v628_v51 = vmul.f32 %v1467_v47, %v537_v35 }
 0x739   :  { %v631_v48 = vpop.permute.xlu0 %630 }
 0x73a   :  { %v633_v50 = vmul.f32 %v1467_v47, %v631_v48 }
 0x73c   :  { %635 = vrot.lane.b32.xlu1 %v633_v50, %s1514_s27 }
 0x7ae   :  { %v636_v52 = vpop.permute.xlu1 %635 }
 0x7af   :  { %v638_v55 = vadd.f32 %v636_v52, %v628_v51 }
 0x7b1   :  { %1468 = vtanh.f32 %v638_v55 }
 0x7be   :  { %v1469_v49 = vpop.eup %1468 }
 0x7bf   :  { %641 = vrot.lane.b32.xlu0 %v1469_v49, %s1514_s27 }
 0x831   :  { %v642_v56 = vpop.permute.xlu0 %641 }
 0x832   :  { %v644_v57 = vmul.f32 %v1467_v47, %v642_v56 }
 0x834   :  { %647 = vrot.lane.b32.xlu1 %v644_v57, %s1515_s28 }
 0x8a6   :  { %v648_v58 = vpop.permute.xlu1 %647 }
 0x8a7   :  { %1401 = vmatmul.mubr.msk.f32.vlgmr.msra.gmra.mxu1 %vm340_vm12, %v648_v58 }
 0x8a8   :  { %1411 = vmatpush3.msk.msra.mxu1 %vm344_vm5, %v1605_v22  ;;  %1414 = vmatprep.mubr.msk.f32.mxu1 %vm1512_vm11, %v1511_v11 }
 0x8a9   :  { %1412 = vmatprep.subr.mxu1 %v1511_v11 }
 0x8aa   :  { %1413 = vmatpush3.msra.mxu1 %v1613_v24 }
 0x8ab   :  { %1424 = vmatprep.subr.mxu1 %v1511_v11 }
 0x967   :  { %v717_v60 = vpop.f32.mrf.mxu1 }
 0x968   :  { %v721_v61 = vadd.f32 %v717_v60, %v1661_v53 }
 0x969   :  { %v1402_v62 = vpop.f32.mrf.mxu1 }
 0x96a   :  { %1470 = vtanh.f32 %v721_v61  ;;  %v1280_v1 = vmul.f32 -1.442695, %v721_v61 }
 0x96c   :  { %1472 = vpow2.f32 %v1280_v1 }
 0x977   :  { %v1471_v0 = vpop.eup %1470 }
 0x978   :  { %731 = vrot.lane.b32.xlu0 %v1471_v0, %s1513_s3 }
 0x979   :  { %v1473_v3 = vpop.eup %1472 }
 0x97a   :  { %v725_v4 = vadd.f32 1.0, %v1473_v3 }
 0x97c   :  { %1474 = vrcp.f32 %v725_v4 }
 0x989   :  { %v1475_v5 = vpop.eup %1474 }
 0x98a   :  { %v729_v8 = vmul.f32 %v1475_v5, %v638_v55 }
 0x9ea   :  { %v732_v6 = vpop.permute.xlu0 %731 }
 0x9eb   :  { %v734_v7 = vmul.f32 %v1475_v5, %v732_v6 }
 0x9ed   :  { %736 = vrot.lane.b32.xlu1 %v734_v7, %s1514_s27 }
 0xa5f   :  { %v737_v9 = vpop.permute.xlu1 %736 }
 0xa60   :  { %v739_v10 = vadd.f32 %v737_v9, %v729_v8 }
 0xa62   :  { %1476 = vtanh.f32 %v739_v10 }
 0xa6f   :  { %v1477_v53 = vpop.eup %1476 }
 0xa70   :  { %742 = vrot.lane.b32.xlu0 %v1477_v53, %s1514_s27 }
 0xae2   :  { %v743_v12 = vpop.permute.xlu0 %742 }
 0xae3   :  { %v745_v13 = vmul.f32 %v1475_v5, %v743_v12 }
 0xae5   :  { %748 = vrot.lane.b32.xlu1 %v745_v13, %s1515_s28 }
 0xb57   :  { %v749_v14 = vpop.permute.xlu1 %748 }
 0xb58   :  { %1408 = vmatmul.mubr.msk.f32.vlgmr.msra.gmra.mxu0 %vm340_vm12, %v749_v14 }
 0xb59   :  { %1418 = vmatpush3.msk.msra.mxu0 %vm344_vm5, %v1605_v22  ;;  %1421 = vmatprep.mubr.msk.f32.mxu0 %vm1512_vm11, %v1511_v11 }
 0xb5a   :  { %1419 = vmatprep.subr.mxu0 %v1511_v11 }
 0xb5b   :  { %1420 = vmatpush3.msra.mxu0 %v1613_v24 }
 0xb5c   :  { %1431 = vmatprep.subr.mxu0 %v1511_v11 }
 0xc18   :  { %v818_v15 = vpop.f32.mrf.mxu0 }
 0xc19   :  { %v822_v16 = vadd.f32 %v818_v15, %v1665_v59 }
 0xc1a   :  { %v1409_v17 = vpop.f32.mrf.mxu0 }
 0xc1b   :  { %1478 = vtanh.f32 %v822_v16  ;;  %v1283_v19 = vmul.f32 -1.442695, %v822_v16  ;;  %v1150_v17 = vld [vmem:[%s1773_s5] sm:$0xff] }
 0xc1d   :  { %1480 = vpow2.f32 %v1283_v19 }
 0xc28   :  { %v1479_v18 = vpop.eup %1478 }
 0xc29   :  { %832 = vrot.lane.b32.xlu0 %v1479_v18, %s1513_s3 }
 0xc2a   :  { %v1481_v20 = vpop.eup %1480 }
 0xc2b   :  { %v826_v21 = vadd.f32 1.0, %v1481_v20 }
 0xc2d   :  { %1482 = vrcp.f32 %v826_v21 }
 0xc3a   :  { %v1483_v23 = vpop.eup %1482 }
 0xc3b   :  { %v830_v27 = vmul.f32 %v1483_v23, %v739_v10 }
 0xc9b   :  { %v833_v25 = vpop.permute.xlu0 %832 }
 0xc9c   :  { %v835_v26 = vmul.f32 %v1483_v23, %v833_v25 }
 0xc9e   :  { %837 = vrot.lane.b32.xlu1 %v835_v26, %s1514_s27 }
 0xd10   :  { %v838_v28 = vpop.permute.xlu1 %837 }
 0xd11   :  { %v840_v29 = vadd.f32 %v838_v28, %v830_v27 }
 0xd13   :  { %1484 = vtanh.f32 %v840_v29 }
 0xd20   :  { %v1485_v59 = vpop.eup %1484 }
 0xd21   :  { %843 = vrot.lane.b32.xlu0 %v1485_v59, %s1514_s27 }
 0xd93   :  { %v844_v30 = vpop.permute.xlu0 %843 }
 0xd94   :  { %v846_v31 = vmul.f32 %v1483_v23, %v844_v30  ;;  %v1293_v23 = vld [vmem:[%s1774_s6] ss:$0 sm:$0xff] }
 0xd96   :  { %849 = vrot.lane.b32.xlu1 %v846_v31, %s1515_s28 }
 0xe08   :  { %v850_v32 = vpop.permute.xlu1 %849 }
 0xe09   :  { %1415 = vmatmul.mubr.msk.f32.vlgmr.msra.gmra.mxu1 %vm340_vm12, %v850_v32 }
 0xe0a   :  { %1425 = vmatpush3.msk.msra.mxu1 %vm344_vm5, %v1605_v22  ;;  %1428 = vmatprep.mubr.msk.f32.mxu1 %vm1512_vm11, %v1511_v11 }
 0xe0b   :  { %1426 = vmatprep.subr.mxu1 %v1511_v11 }
 0xe0c   :  { %1427 = vmatpush3.msra.mxu1 %v1613_v24 }
 0xec9   :  { %v919_v33 = vpop.f32.mrf.mxu1 }
 0xeca   :  { %v923_v34 = vadd.f32 %v919_v33, %v1663_v54 }
 0xecb   :  { %v1416_v35 = vpop.f32.mrf.mxu1 }
 0xecc   :  { %1486 = vtanh.f32 %v923_v34  ;;  %v1286_v37 = vmul.f32 -1.442695, %v923_v34 }
 0xece   :  { %1488 = vpow2.f32 %v1286_v37 }
 0xed9   :  { %v1487_v36 = vpop.eup %1486 }
 0xeda   :  { %933 = vrot.lane.b32.xlu0 %v1487_v36, %s1513_s3 }
 0xedb   :  { %v1489_v38 = vpop.eup %1488 }
 0xedc   :  { %v927_v39 = vadd.f32 1.0, %v1489_v38 }
 0xede   :  { %1490 = vrcp.f32 %v927_v39 }
 0xeeb   :  { %v1491_v22 = vpop.eup %1490 }
 0xeec   :  { %v931_v42 = vmul.f32 %v1491_v22, %v840_v29 }
 0xf4c   :  { %v934_v40 = vpop.permute.xlu0 %933 }
 0xf4d   :  { %v936_v41 = vmul.f32 %v1491_v22, %v934_v40 }
 0xf4f   :  { %938 = vrot.lane.b32.xlu1 %v936_v41, %s1514_s27 }
 0xfc1   :  { %v939_v24 = vpop.permute.xlu1 %938 }
 0xfc2   :  { %v941_v43 = vadd.f32 %v939_v24, %v931_v42 }
 0xfc4   :  { %1492 = vtanh.f32 %v941_v43 }
 0xfd1   :  { %v1493_v54 = vpop.eup %1492 }
 0xfd2   :  { %944 = vrot.lane.b32.xlu0 %v1493_v54, %s1514_s27 }
0x1044   :  { %v945_v44 = vpop.permute.xlu0 %944 }
0x1045   :  { %v947_v45 = vmul.f32 %v1491_v22, %v945_v44 }
0x1047   :  { %950 = vrot.lane.b32.xlu1 %v947_v45, %s1515_s28 }
0x10b9   :  { %v951_v46 = vpop.permute.xlu1 %950 }
0x10ba   :  { %1422 = vmatmul.mubr.msk.f32.vlgmr.msra.gmra.mxu0 %vm340_vm12, %v951_v46 }
0x10bb   :  { %1435 = vmatprep.mubr.msk.f32.mxu0 %vm1512_vm11, %v1511_v11 }
0x117a   :  { %v1020_v47 = vpop.f32.mrf.mxu0 }
0x117b   :  { %v1024_v48 = vadd.f32 %v1020_v47, %v1669_v2 }
0x117c   :  { %v1423_v50 = vpop.f32.mrf.mxu0 }
0x117d   :  { %1494 = vtanh.f32 %v1024_v48  ;;  %v1289_v52 = vmul.f32 -1.442695, %v1024_v48 }
0x117f   :  { %1496 = vpow2.f32 %v1289_v52 }
0x118a   :  { %v1495_v51 = vpop.eup %1494 }
0x118b   :  { %1034 = vrot.lane.b32.xlu0 %v1495_v51, %s1513_s3 }
0x118c   :  { %v1497_v55 = vpop.eup %1496 }
0x118d   :  { %v1028_v49 = vadd.f32 1.0, %v1497_v55 }
0x118f   :  { %1498 = vrcp.f32 %v1028_v49 }
0x119c   :  { %v1499_v56 = vpop.eup %1498 }
0x119d   :  { %v1032_v60 = vmul.f32 %v1499_v56, %v941_v43 }
0x11fd   :  { %v1035_v57 = vpop.permute.xlu0 %1034 }
0x11fe   :  { %v1037_v58 = vmul.f32 %v1499_v56, %v1035_v57 }
0x1200   :  { %1039 = vrot.lane.b32.xlu1 %v1037_v58, %s1514_s27 }
0x1272   :  { %v1040_v61 = vpop.permute.xlu1 %1039 }
0x1273   :  { %v1042_v62 = vadd.f32 %v1040_v61, %v1032_v60 }
0x1275   :  { %1500 = vtanh.f32 %v1042_v62 }
0x1282   :  { %v1501_v2 = vpop.eup %1500 }
0x1283   :  { %1045 = vrot.lane.b32.xlu0 %v1501_v2, %s1514_s27 }
0x12f5   :  { %v1046_v0 = vpop.permute.xlu0 %1045 }
0x12f6   :  { %v1048_v1 = vmul.f32 %v1499_v56, %v1046_v0 }
0x12f8   :  { %1051 = vrot.lane.b32.xlu1 %v1048_v1, %s1515_s28 }
0x136a   :  { %v1052_v3 = vpop.permute.xlu1 %1051 }
0x136b   :  { %1429 = vmatmul.mubr.msk.f32.vlgmr.msra.gmra.mxu1 %vm340_vm12, %v1052_v3 }
0x142b   :  { %v1121_v4 = vpop.f32.mrf.mxu1 }
0x142c   :  { %v1125_v5 = vadd.f32 %v1121_v4, %v1667_v63  ;;  %v1151_v63 = vld [vmem:[%s1773_s5 + $0x8] sm:$0x3] }
0x142d   :  { %v1430_v6 = vpop.f32.mrf.mxu1  ;;  %1432 = vmatpush3.msk.msra.mxu0 %vm344_vm5, %v1151_v63 }
0x142e   :  { %1502 = vtanh.f32 %v1125_v5  ;;  %v1292_v8 = vmul.f32 -1.442695, %v1125_v5  ;;  %1433 = vmatprep.subr.mxu0 %v1511_v11 }
0x142f   :  { %1434 = vmatpush3.msra.mxu0 %v1150_v17 }
0x1430   :  { %1504 = vpow2.f32 %v1292_v8 }
0x143b   :  { %v1503_v7 = vpop.eup %1502 }
0x143c   :  { %1135 = vrot.lane.b32.xlu0 %v1503_v7, %s1513_s3 }
0x143d   :  { %v1505_v9 = vpop.eup %1504 }
0x143e   :  { %v1129_v10 = vadd.f32 1.0, %v1505_v9 }
0x1440   :  { %1506 = vrcp.f32 %v1129_v10 }
0x144d   :  { %v1507_v53 = vpop.eup %1506 }
0x144e   :  { %v1133_v14 = vmul.f32 %v1507_v53, %v1042_v62 }
0x14ae   :  { %v1136_v12 = vpop.permute.xlu0 %1135 }
0x14af   :  { %v1138_v13 = vmul.f32 %v1507_v53, %v1136_v12 }
0x14b1   :  { %1140 = vrot.lane.b32.xlu1 %v1138_v13, %s1514_s27 }
0x1523   :  { %v1141_v15 = vpop.permute.xlu1 %1140 }
0x1524   :  { %v1143_v16 = vadd.f32 %v1141_v15, %v1133_v14 }
0x1526   :  { %1508 = vtanh.f32 %v1143_v16 }
0x1533   :  { %v1509_v18 = vpop.eup %1508 }
0x1534   :  { %1146 = vrot.lane.b32.xlu0 %v1509_v18, %s1514_s27 }
0x15a6   :  { %v1147_v19 = vpop.permute.xlu0 %1146 }
0x15a7   :  { %v1149_v20 = vmul.f32 %v1507_v53, %v1147_v19 }
0x15a9   :  { %1160 = vrot.lane.b32.xlu1 %v1149_v20, %s1515_s28 }
0x161b   :  { %v1161_v21 = vpop.permute.xlu1 %1160 }
0x161c   :  { %1436 = vmatmul.mubr.msk.f32.vlgmr.msra.gmra.mxu0 %vm340_vm12, %v1161_v21 }
0x16dc   :  { %v1233_v25 = vpop.f32.mrf.mxu0 }
0x16dd   :  { %v1234_v26 = vadd.f32 %v1293_v23, %v1233_v25 }
0x16de   :  { %v1437_v27 = vpop.f32.mrf.mxu0 }
0x16df   :  { %1238 = vst.msk [vmem:[%s1775_s7] sm:$0xff] %vm1237_vm13, %v1234_v26 }

</bundles_post_ra>
